<compile_context>
chip_gen: v7x
topology: tpu7x:2x2x1
jax: 0.10.0
libtpu: 0.0.40
codegen_flags: <defaults>
</compile_context>

<pallas_src>
import functools

import jax
import jax.numpy as jnp
from jax import lax
from jax.experimental import pallas as pl
from jax.experimental.pallas import tpu as pltpu


def _channel_attention_kernel(x_ref, w1_ref, w2_ref, out_ref,
                              max_acc, sum_acc, *, hw_total, hw_tile,
                              needs_mask):
    # x_ref:   (1, C, Thw)  channels on sublanes, spatial chunk on lanes
    # w1_ref:  (Cr, C)      first 1x1 conv weight (un-transposed)
    # w2_ref:  (C, Cr)      second 1x1 conv weight (un-transposed)
    # out_ref: (1, C, 1)    sigmoid attention weights for this batch element
    # max_acc: (C, 1) f32   running spatial max   (VMEM scratch)
    # sum_acc: (C, 1) f32   running spatial sum   (VMEM scratch)
    k = pl.program_id(1)
    n_k = pl.num_programs(1)

    @pl.when(k == 0)
    def _init():
        max_acc[...] = jnp.full_like(max_acc, -jnp.inf)
        sum_acc[...] = jnp.zeros_like(sum_acc)

    def _accumulate(mask_tail):
        xb = x_ref[0].astype(jnp.float32)                    # (C, Thw)
        if mask_tail:
            # Only the (partial) last tile reaches here; mask OOB lanes.
            lane = lax.broadcasted_iota(jnp.int32, xb.shape, 1)
            valid = (k * hw_tile + lane) < hw_total
            x_max = jnp.where(valid, xb, -jnp.inf)
            x_sum = jnp.where(valid, xb, 0.0)
        else:
            x_max = xb
            x_sum = xb
        max_acc[...] = jnp.maximum(max_acc[...],
                                   jnp.max(x_max, axis=-1, keepdims=True))
        sum_acc[...] = sum_acc[...] + jnp.sum(x_sum, axis=-1, keepdims=True)

    if needs_mask:
        @pl.when(k < n_k - 1)
        def _full_tile():
            _accumulate(False)

        @pl.when(k == n_k - 1)
        def _tail_tile():
            _accumulate(True)
    else:
        _accumulate(False)

    @pl.when(k == n_k - 1)
    def _finalize():
        avg_col = sum_acc[...] * (1.0 / float(hw_total))            # (C, 1)
        pooled = jnp.concatenate([max_acc[...], avg_col], axis=-1)  # (C, 2)
        # Shared SE MLP (1x1 convs as matmuls), both pooled vectors at once.
        h = jnp.maximum(
            jnp.dot(w1_ref[...].astype(jnp.float32), pooled,
                    preferred_element_type=jnp.float32), 0.0)       # (Cr, 2)
        o = jnp.dot(w2_ref[...].astype(jnp.float32), h,
                    preferred_element_type=jnp.float32)             # (C, 2)
        combined = o[:, 0:1] + o[:, 1:2]                            # (C, 1)
        out_ref[0] = jax.nn.sigmoid(combined).astype(out_ref.dtype)


def _pick_hw_tile(hw, c, itemsize, target_bytes=1 << 20):
    """Spatial tile: 128-lane multiple targeting ~1 MiB per block.

    A partial last tile is legal (the kernel masks it), so HW need not divide
    the tile.  When HW already fits the target, a single full-HW tile is used
    (block dim == full array dim is always legal).
    """
    lanes = max(128, (target_bytes // max(c * itemsize, 1)) // 128 * 128)
    if hw <= lanes:
        return int(hw)
    return int(lanes)


def channel_attention(x_nchw, w1, w2, hw_tile=None):
    """x_nchw: (B, C, H, W); w1: (Cr, C); w2: (C, Cr). Returns (B, C, 1, 1)."""
    B, C, H, W = x_nchw.shape
    Cr = w1.shape[0]
    HW = H * W

    # Free reshape only -- no HBM transpose of the activation tensor.
    x_flat = x_nchw.reshape(B, C, HW)                      # (B, C, HW)

    if hw_tile is None:
        hw_tile = _pick_hw_tile(HW, C, x_flat.dtype.itemsize)
    assert hw_tile == HW or hw_tile % 128 == 0, "invalid spatial tile"
    assert hw_tile <= HW
    n_k = pl.cdiv(HW, hw_tile)
    needs_mask = (HW % hw_tile) != 0

    kernel = functools.partial(_channel_attention_kernel,
                               hw_total=HW, hw_tile=hw_tile,
                               needs_mask=needs_mask)

    cost = pl.CostEstimate(
        flops=int(2 * B * C * HW + 8 * B * C * Cr),
        transcendentals=int(B * C),
        bytes_accessed=int((B * C * HW + 2 * C * Cr) * x_flat.dtype.itemsize
                           + B * C * x_flat.dtype.itemsize),
    )

    out = pl.pallas_call(
        kernel,
        out_shape=jax.ShapeDtypeStruct((B, C, 1), x_nchw.dtype),
        grid_spec=pltpu.PrefetchScalarGridSpec(
            num_scalar_prefetch=0,
            grid=(B, n_k),
            in_specs=[
                pl.BlockSpec((1, C, hw_tile), lambda b, k: (b, 0, k)),
                pl.BlockSpec((Cr, C), lambda b, k: (0, 0)),
                pl.BlockSpec((C, Cr), lambda b, k: (0, 0)),
            ],
            out_specs=pl.BlockSpec((1, C, 1), lambda b, k: (b, 0, 0)),
            scratch_shapes=[
                pltpu.VMEM((C, 1), jnp.float32),   # running max
                pltpu.VMEM((C, 1), jnp.float32),   # running sum
            ],
        ),
        compiler_params=pltpu.CompilerParams(
            dimension_semantics=("parallel", "arbitrary")),
        cost_estimate=cost,
    )(x_flat, w1, w2)

    return out.reshape(B, C, 1, 1)


def _reference(x_nchw, w1, w2):
    # Pure-JAX reference mirroring the PyTorch module.
    max_p = jnp.max(x_nchw, axis=(2, 3))      # (B, C)
    avg_p = jnp.mean(x_nchw, axis=(2, 3))     # (B, C)

    def se(p):
        h = jnp.maximum(p @ w1.T, 0.0)        # (B, Cr)
        return h @ w2.T                       # (B, C)

    return jax.nn.sigmoid(se(max_p) + se(avg_p)).reshape(*max_p.shape, 1, 1)


if __name__ == "__main__":
    B, C = 2, 64
    reduction = 16
    Cr = C // reduction

    key = jax.random.PRNGKey(0)
    kx, k1, k2 = jax.random.split(key, 3)

    # Deterministic synthetic conv weights (Conv2d 1x1, no bias):
    #   w1: (C//r, C), w2: (C, C//r)  -- kaiming-ish scale
    w1 = jax.random.normal(k1, (Cr, C), dtype=jnp.float32) * (2.0 / C) ** 0.5
    w2 = jax.random.normal(k2, (C, Cr), dtype=jnp.float32) * (2.0 / Cr) ** 0.5

    # 1) Default (single spatial tile) path.
    x = jax.random.normal(kx, (B, C, 16, 16), dtype=jnp.float32)
    out = jax.block_until_ready(channel_attention(x, w1, w2))
    ref = _reference(x, w1, w2)
    assert out.shape == (B, C, 1, 1)
    assert jnp.allclose(out, ref, atol=1e-5, rtol=1e-5)

    # 2) Multi-tile spatial reduction, even division (no masking emitted):
    #    HW = 16*32 = 512 split into tiles of 256.
    x2 = jax.random.normal(kx, (B, C, 16, 32), dtype=jnp.float32)
    out2 = jax.block_until_ready(channel_attention(x2, w1, w2, hw_tile=256))
    ref2 = _reference(x2, w1, w2)
    assert jnp.allclose(out2, ref2, atol=1e-5, rtol=1e-5)

    # 3) Multi-tile with a partial (lane-masked) last tile:
    #    HW = 10*30 = 300 split into tiles of 128 -> last tile 44 valid lanes.
    x3 = jax.random.normal(kx, (B, C, 10, 30), dtype=jnp.float32)
    out3 = jax.block_until_ready(channel_attention(x3, w1, w2, hw_tile=128))
    ref3 = _reference(x3, w1, w2)
    assert jnp.allclose(out3, ref3, atol=1e-5, rtol=1e-5)

    print("KERNEL_OK")
</pallas_src>

<mosaic_0001>
module attributes {stable_mosaic.version = 11 : i64} {
  func.func @_channel_attention_kernel(%arg0: i32, %arg1: i32, %arg2: memref<1x64x256xf32, #tpu.memory_space<vmem>>, %arg3: memref<4x64xf32, #tpu.memory_space<vmem>>, %arg4: memref<64x4xf32, #tpu.memory_space<vmem>>, %arg5: memref<1x64x1xf32, #tpu.memory_space<vmem>>, %arg6: memref<64x1xf32, #tpu.memory_space<vmem>>, %arg7: memref<64x1xf32, #tpu.memory_space<vmem>>) attributes {dimension_semantics = [#tpu.dimension_semantics<parallel>, #tpu.dimension_semantics<arbitrary>], iteration_bounds = array<i64: 2, 1>, scalar_prefetch = 0 : i64, scratch_operands = 2 : i64, tpu.core_type = #tpu.core_type<tc>, window_params = [{transform_indices = @transform_0, window_bounds = array<i64: 1, 64, 256>}, {pipeline_mode = #tpu.pipeline_mode<synchronous>, transform_indices = @transform_1, window_bounds = array<i64: 4, 64>}, {pipeline_mode = #tpu.pipeline_mode<synchronous>, transform_indices = @transform_2, window_bounds = array<i64: 64, 4>}, {transform_indices = @transform_3, window_bounds = array<i64: 1, 64, 1>}]} {
    %c0_i32 = arith.constant 0 : i32
    %0 = arith.cmpi eq, %arg1, %c0_i32 : i32
    %1 = arith.extui %0 : i1 to i32
    %c0_i32_0 = arith.constant 0 : i32
    %2 = arith.cmpi ne, %1, %c0_i32_0 : i32
    scf.if %2 {
      %cst_14 = arith.constant 0xFF800000 : f32
      %18 = vector.broadcast %cst_14 : f32 to vector<64x1xf32>
      %c0_15 = arith.constant 0 : index
      %c0_16 = arith.constant 0 : index
      %19 = vector.load %arg6[%c0_15, %c0_16] : memref<64x1xf32, #tpu.memory_space<vmem>>, vector<64x1xf32>
      tpu.vector_store %arg6[%c0_15, %c0_16], %18 {strides = array<i32>} : memref<64x1xf32, #tpu.memory_space<vmem>>, vector<64x1xf32>,
      %cst_17 = arith.constant 0.000000e+00 : f32
      %20 = vector.broadcast %cst_17 : f32 to vector<64x1xf32>
      %c0_18 = arith.constant 0 : index
      %c0_19 = arith.constant 0 : index
      %21 = vector.load %arg7[%c0_18, %c0_19] : memref<64x1xf32, #tpu.memory_space<vmem>>, vector<64x1xf32>
      tpu.vector_store %arg7[%c0_18, %c0_19], %20 {strides = array<i32>} : memref<64x1xf32, #tpu.memory_space<vmem>>, vector<64x1xf32>,
    } else {
    }
    %c0 = arith.constant 0 : index
    %c0_1 = arith.constant 0 : index
    %c0_2 = arith.constant 0 : index
    %3 = vector.load %arg2[%c0, %c0_1, %c0_2] : memref<1x64x256xf32, #tpu.memory_space<vmem>>, vector<1x64x256xf32>
    %4 = vector.shape_cast %3 : vector<1x64x256xf32> to vector<64x256xf32>
    %c0_3 = arith.constant 0 : index
    %c0_4 = arith.constant 0 : index
    %5 = vector.load %arg6[%c0_3, %c0_4] : memref<64x1xf32, #tpu.memory_space<vmem>>, vector<64x1xf32>
    %cst = arith.constant dense<0xFF800000> : vector<64xf32>
    %6 = vector.multi_reduction <maximumf>, %4, %cst [1] : vector<64x256xf32> to vector<64xf32>
    %7 = vector.shape_cast %6 : vector<64xf32> to vector<64x1xf32>
    %8 = arith.maximumf %5, %7 : vector<64x1xf32>
    %c0_5 = arith.constant 0 : index
    %c0_6 = arith.constant 0 : index
    %9 = vector.load %arg6[%c0_5, %c0_6] : memref<64x1xf32, #tpu.memory_space<vmem>>, vector<64x1xf32>
    tpu.vector_store %arg6[%c0_5, %c0_6], %8 {strides = array<i32>} : memref<64x1xf32, #tpu.memory_space<vmem>>, vector<64x1xf32>,
    %c0_7 = arith.constant 0 : index
    %c0_8 = arith.constant 0 : index
    %10 = vector.load %arg7[%c0_7, %c0_8] : memref<64x1xf32, #tpu.memory_space<vmem>>, vector<64x1xf32>
    %cst_9 = arith.constant dense<0.000000e+00> : vector<64xf32>
    %11 = vector.multi_reduction <add>, %4, %cst_9 [1] : vector<64x256xf32> to vector<64xf32>
    %12 = vector.shape_cast %11 : vector<64xf32> to vector<64x1xf32>
    %13 = arith.addf %10, %12 : vector<64x1xf32>
    %c0_10 = arith.constant 0 : index
    %c0_11 = arith.constant 0 : index
    %14 = vector.load %arg7[%c0_10, %c0_11] : memref<64x1xf32, #tpu.memory_space<vmem>>, vector<64x1xf32>
    tpu.vector_store %arg7[%c0_10, %c0_11], %13 {strides = array<i32>} : memref<64x1xf32, #tpu.memory_space<vmem>>, vector<64x1xf32>,
    %c0_i32_12 = arith.constant 0 : i32
    %15 = arith.cmpi eq, %arg1, %c0_i32_12 : i32
    %16 = arith.extui %15 : i1 to i32
    %c0_i32_13 = arith.constant 0 : i32
    %17 = arith.cmpi ne, %16, %c0_i32_13 : i32
    scf.if %17 {
      %c0_14 = arith.constant 0 : index
      %c0_15 = arith.constant 0 : index
      %18 = vector.load %arg7[%c0_14, %c0_15] : memref<64x1xf32, #tpu.memory_space<vmem>>, vector<64x1xf32>
      %cst_16 = arith.constant 3.906250e-03 : f32
      %19 = vector.broadcast %cst_16 : f32 to vector<64x1xf32>
      %20 = arith.mulf %18, %19 : vector<64x1xf32>
      %c0_17 = arith.constant 0 : index
      %c0_18 = arith.constant 0 : index
      %21 = vector.load %arg6[%c0_17, %c0_18] : memref<64x1xf32, #tpu.memory_space<vmem>>, vector<64x1xf32>
      %22 = tpu.concatenate %21, %20 in 1 : vector<64x1xf32>, vector<64x1xf32> -> vector<64x2xf32>
      %c0_19 = arith.constant 0 : index
      %c0_20 = arith.constant 0 : index
      %23 = vector.load %arg3[%c0_19, %c0_20] : memref<4x64xf32, #tpu.memory_space<vmem>>, vector<4x64xf32>
      %cst_21 = arith.constant dense<0.000000e+00> : vector<4x2xf32>
      %24 = tpu.matmul %23, %22, %cst_21 {dimension_numbers = #tpu.dot_dimension_numbers<[1], [0], [0], [1], [0, 0, 1, 1], [], []>} : vector<4x64xf32>, vector<64x2xf32>, vector<4x2xf32> -> vector<4x2xf32>
      %cst_22 = arith.constant 0.000000e+00 : f32
      %25 = vector.broadcast %cst_22 : f32 to vector<4x2xf32>
      %26 = arith.maximumf %24, %25 : vector<4x2xf32>
      %c0_23 = arith.constant 0 : index
      %c0_24 = arith.constant 0 : index
      %27 = vector.load %arg4[%c0_23, %c0_24] : memref<64x4xf32, #tpu.memory_space<vmem>>, vector<64x4xf32>
      %cst_25 = arith.constant dense<0.000000e+00> : vector<64x2xf32>
      %28 = tpu.matmul %27, %26, %cst_25 {dimension_numbers = #tpu.dot_dimension_numbers<[1], [0], [0], [1], [0, 0, 1, 1], [], []>} : vector<64x4xf32>, vector<4x2xf32>, vector<64x2xf32> -> vector<64x2xf32>
      %29 = vector.extract_strided_slice %28 {offsets = [0, 0], sizes = [64, 1], strides = [1, 1]} : vector<64x2xf32> to vector<64x1xf32>
      %30 = vector.extract_strided_slice %28 {offsets = [0, 1], sizes = [64, 1], strides = [1, 1]} : vector<64x2xf32> to vector<64x1xf32>
      %31 = arith.addf %29, %30 : vector<64x1xf32>
      %32 = arith.negf %31 : vector<64x1xf32>
      %33 = math.exp %32 : vector<64x1xf32>
      %cst_26 = arith.constant 1.000000e+00 : f32
      %34 = vector.broadcast %cst_26 : f32 to vector<64x1xf32>
      %35 = arith.addf %34, %33 : vector<64x1xf32>
      %36 = arith.divf %34, %35 : vector<64x1xf32>
      %c0_27 = arith.constant 0 : index
      %c0_28 = arith.constant 0 : index
      %c0_29 = arith.constant 0 : index
      %37 = vector.load %arg5[%c0_27, %c0_28, %c0_29] : memref<1x64x1xf32, #tpu.memory_space<vmem>>, vector<1x64x1xf32>
      %38 = vector.shape_cast %37 : vector<1x64x1xf32> to vector<64x1xf32>
      %39 = vector.shape_cast %36 : vector<64x1xf32> to vector<1x64x1xf32>
      tpu.vector_store %arg5[%c0_27, %c0_28, %c0_29], %39 {strides = array<i32>} : memref<1x64x1xf32, #tpu.memory_space<vmem>>, vector<1x64x1xf32>,
    } else {
    }
    return
  }
  func.func @transform_0(%arg0: i32, %arg1: i32) -> (i32, i32, i32) {
    %c0_i32 = arith.constant 0 : i32
    %c0_i32_0 = arith.constant 0 : i32
    return %arg0, %c0_i32, %arg1 : i32, i32, i32
  }
  func.func @transform_1(%arg0: i32, %arg1: i32) -> (i32, i32) {
    %c0_i32 = arith.constant 0 : i32
    %c0_i32_0 = arith.constant 0 : i32
    %c0_i32_1 = arith.constant 0 : i32
    return %c0_i32, %c0_i32_0 : i32, i32
  }
  func.func @transform_2(%arg0: i32, %arg1: i32) -> (i32, i32) {
    %c0_i32 = arith.constant 0 : i32
    %c0_i32_0 = arith.constant 0 : i32
    %c0_i32_1 = arith.constant 0 : i32
    return %c0_i32, %c0_i32_0 : i32, i32
  }
  func.func @transform_3(%arg0: i32, %arg1: i32) -> (i32, i32, i32) {
    %c0_i32 = arith.constant 0 : i32
    %c0_i32_0 = arith.constant 0 : i32
    %c0_i32_1 = arith.constant 0 : i32
    return %arg0, %c0_i32, %c0_i32_0 : i32, i32, i32
  }
}

</mosaic_0001>

<bundles_post_ra>
// kernel: tpu_custom_call.1
= control target key start
LH: loop header
LB: loop body
LE: loop exit
PB: predicated region body
PF: predicated region fallthrough
CT: control target
= control target key end

     0   :  { %8 = vsyncpa [#allocation5], 0  ;;  %s1365_s0 = inlined_call_operand.hbm [shape: f32[2,64,256], index: 0, kind: input, shape index: {}]   ;;  %s1366_s1 = inlined_call_operand.vmem [shape: f32[4,64], index: 1, kind: input, shape index: {}]   ;;  %s1367_s2 = inlined_call_operand.vmem [shape: f32[64,4], index: 2, kind: input, shape index: {}]   ;;  %s1368_s3 = inlined_call_operand.vmem [shape: f32[2,64,1], index: 3, kind: output, shape index: {}]  }
   0x1   :  { %10 = vsyncpa [#allocation5 + $0x1], 0  ;;  %s1123_s12 = smov 0   ;;  %s1125_s13 = smov 0  }
   0x2   :  { %s1127_s14 = smov 0   ;;  %s1129_s15 = smov 0  }
   0x3   :  { %s1131_s16 = smov 0   ;;  %s1133_s17 = smov 0  }
   0x4 LB: > { %s801_s18 = sadd.s32 4294967295, %s1092_s17   ;;  %s28_s19 = sadd.s32 1, %s1088_s16  ;;  %s1092_s17 = sphi %s1133_s17, %s16_s17   ;;  %s1088_s16 = sphi %s1131_s16, %s1376_s16   ;;  %s1084_s15 = sphi %s1129_s15, %s1375_s15   ;;  %s1080_s14 = sphi %s1127_s14, %s1374_s14   ;;  %s1076_s13 = sphi %s1125_s13, %s1373_s13   ;;  %s1072_s12 = sphi %s1123_s12, %s1372_s12  }
   0x5   : > { %p30_p0 = scmp.ge.s32.totalorder %s28_s19, 2  ;;  %s37_s20 = sadd.s32 1, %s1080_s14 }
   0x6   : > { %p44_p1 = scmp.ne.s32.totalorder %s1080_s14, %s1076_s13  ;;  %p45_p2 = scmp.eq.s32.totalorder %s1092_s17, 0 }
   0x7   : > { %s1378_s19 = smov (%p30_p0, %s28_s19), 0  ;;  %p50_p4 = scmp.ne.s32.totalorder %s1076_s13, %s1072_s12 }
   0x8   : > { %p1159_p3 = por %p45_p2, %p44_p1  ;;  %s32_s22 = ssub.s32 %s1088_s16, %s1378_s19 }
   0x9   : > { %p51_p5 = scmp.eq.s32.totalorder %s801_s18, 0  ;;  %p35_p6 = scmp.eq.s32.totalorder %s32_s22, 0 }
   0xa   : > { %p903_p8 = scmp.lt.s32.totalorder %s1092_s17, 2  ;;  %s148_s25 = sand.u32 1, %s1080_s14  }
   0xb   : > { %p1166_p7 = por %p51_p5, %p50_p4  ;;  %s832_s26 = sshll.u32 %s1088_s16, 11 }
   0xc   : > { %s1172_s24 = scalar_select %p35_p6, %s1080_s14, %s37_s20  }
   0xd   : > { %s805_s27 = sshll.u32 %s148_s25, 7  ;;  %s1179_s30 = scalar_lea.hbm %s1365_s0, %s832_s26 }
   0xe   : > { %s152_s4 = scalar_lea.vmem [#allocation4], %s805_s27  ;;  %p1183_p9 = pnand %p903_p8, %p1159_p3 }
   0xf   : > { %s161_s5 = sshll.u32 %s152_s4, 4  ;;  %s1189_s7 = scalar_lea.sflag [#allocation5], %s148_s25  ;;  %s1187_s5 = int_to_ptr.vmem [resolvable:$true] %s161_s5 }
  0x10   : > { %s1012_s8 = scalar_lea.hbm %s1179_s30, 2048  ;;  %p1014_p11 = pneg %p1183_p9 }
  0x11   : > { %p1013_p10 = scmp.ne.s32.totalorder %s1179_s30, %s1012_s8  ;;  %s1017_s11 = scalar_lea.hbm %s1365_s0, 4096 }
  0x12   : > { %p1018_p0 = scmp.lt.u32.totalorder %s1179_s30, %s1365_s0  ;;  %p1019_p1 = scmp.lt.u32.totalorder %s1017_s11, %s1012_s8 }
  0x13   : > { %p1015_p12 = pnand %p1014_p11, %p1013_p10  ;;  %p1021_p3 = scmp.lt.u32.totalorder %s1012_s8, %s1179_s30 }
  0x14   : > { %p1020_p2 = por %p1019_p1, %p1018_p0 }
  0x15   : > { %p1016_p13 = pneg %p1015_p12 }
  0x16   : > { %p1022_p4 = por %p1021_p3, %p1020_p2 }
  0x18   : > { %p1023_p5 = pnand %p1022_p4, %p1016_p13 }
  0x1a   : > { %1026 = shalt.err (!%p1023_p5)
}
  0x1b   : > { %s1027_s20 = scalar_lea.vmem %s1187_s5, 2048  ;;  %s1094_s21 = smov [#allocation4]  }
  0x1c   : > { %p1028_p6 = scmp.ne.s32.totalorder %s1187_s5, %s1027_s20  ;;  %s1032_s22 = sshll.u32 %s1094_s21, 4  ;;  %s1033_s22 = int_to_ptr.vmem [resolvable:$false] %s1032_s22 }
  0x1d   : > { %s1034_s25 = scalar_lea.vmem %s1033_s22, 4096  ;;  %p1035_p12 = scmp.lt.s32.totalorder %s1187_s5, %s1033_s22 }
  0x1e   : > { %p1030_p8 = pnand %p1028_p6, %p1014_p11  ;;  %p1036_p0 = scmp.lt.s32.totalorder %s1034_s25, %s1027_s20 }
  0x20   : > { %p1031_p10 = pneg %p1030_p8  ;;  %p1037_p1 = por %p1036_p0, %p1035_p12 }
  0x22   : > { %p1038_p2 = pnand %p1037_p1, %p1031_p10 }
  0x24   : > { %1041 = shalt.err (!%p1038_p2)
}
  0x25   : > { %s1095_s26 = smov 256   ;;  %s1096_s27 = smov 16  }
  0x26   : > { %902 = dma.hbm_to_vmem [thread:$0]  (!%p1183_p9), %s1179_s30, 2048, %s1187_s5, %s1189_s7, %s1095_s26, %s1095_s26, %s1096_s27  }
  0x27   : > { %p808_p11 = scmp.ge.s32.totalorder %s1092_s17, 1  ;;  %p169_p13 = scmp.lt.s32.totalorder %s1092_s17, 3 }
  0x29   : > { %p170_p3 = pnand %p808_p11, %p169_p13 }
  0x2a   : > { %s175_s28 = sand.u32 (!%p170_p3), 1, %s1076_s13  }
  0x2b   : > { %173 = sbr.rel (%p170_p3) target bundleno = 937 (0x3a9), region = 32  ;;  %s809_s29 = sshll.u32 (!%p170_p3), %s175_s28, 7 }
  0x2c   : > { %s176_s4 = scalar_lea.sflag (!%p170_p3), [#allocation5], %s175_s28  ;;  %s1220_s8 = scalar_lea.vmem (!%p170_p3), [#allocation4], %s809_s29 }
  0x32   : > { %1067 = dma.done.wait (%p1166_p7), %s176_s4, 2048  }
  0x33   : > { %1069 = vsyncadd (%p1166_p7), %s176_s4, 4294965248  ;;  %vm212_vm0 = vcmask 7168   ;;  %v1097_v0 = vmov 0.0   ;;  %v233_v1 = vld [vmem:[%s1220_s8 + $0x20] sm:$0xff]  ;;  %v234_v2 = vld [vmem:[%s1220_s8 + $0x28] sm:$0xff]  ;;  %v1098_v33 = vmov -inf  }
  0x34   : > { %223 = vst.msk [vmem:[#allocation3 + $0x10] sm:$0xff] %vm212_vm0, %v1097_v0  ;;  %221 = vst.msk [vmem:[#allocation3] sm:$0xff] %vm212_vm0, %v1097_v0  ;;  %v229_v3 = vld [vmem:[%s1220_s8] sm:$0xff]  ;;  %v308_v4 = vadd.f32 %v234_v2, %v233_v1  ;;  %v230_v5 = vld [vmem:[%s1220_s8 + $0x8] sm:$0xff]  ;;  %v259_v28 = vmax.f32 %v233_v1, %v234_v2  ;;  %v1099_v55 = vmov 0.0|0.0   ;;  %s1100_s23 = smov 1  }
  0x35   : > { %222 = vst.msk [vmem:[#allocation3 + $0x8] sm:$0xff] %vm212_vm0, %v1097_v0  ;;  %224 = vst.msk [vmem:[#allocation3 + $0x18] sm:$0xff] %vm212_vm0, %v1097_v0  ;;  %v235_v6 = vld [vmem:[%s1220_s8 + $0x30] sm:$0xff]  ;;  %v236_v7 = vld [vmem:[%s1220_s8 + $0x38] sm:$0xff]  ;;  %v302_v8 = vadd.f32 %v230_v5, %v229_v3  ;;  %v253_v26 = vmax.f32 %v229_v3, %v230_v5  ;;  %885 = vmatprep.subr.bf16.mxu0 %v1099_v55  ;;  %vm1101_vm1 = vmmov 0   ;;  %vm410_vm2 = vcmask 523264  }
  0x36   : > { %225 = vst.msk [vmem:[#allocation3 + $0x20] sm:$0xff] %vm212_vm0, %v1097_v0  ;;  %226 = vst.msk [vmem:[#allocation3 + $0x28] sm:$0xff] %vm212_vm0, %v1097_v0  ;;  %v231_v9 = vld [vmem:[%s1220_s8 + $0x10] sm:$0xff]  ;;  %v232_v10 = vld [vmem:[%s1220_s8 + $0x18] sm:$0xff]  ;;  %309 = vadd.xlane.f32.xlu1 %v308_v4  ;;  %v311_v11 = vadd.f32 %v236_v7, %v235_v6  ;;  %v262_v27 = vmax.f32 %v235_v6, %v236_v7  ;;  %868 = vmatprep.mubr.msk.f32.mxu0 %vm1101_vm1, %v1097_v0  ;;  %vm493_vm3 = vcmask 31744   ;;  %vm518_vm4 = vcmask 1043456  }
  0x37   : > { %227 = vst.msk [vmem:[#allocation3 + $0x30] sm:$0xff] %vm212_vm0, %v1097_v0  ;;  %228 = vst.msk [vmem:[#allocation3 + $0x38] sm:$0xff] %vm212_vm0, %v1097_v0  ;;  %303 = vadd.xlane.f32.xlu0 %v302_v8  ;;  %v305_v12 = vadd.f32 %v232_v10, %v231_v9  ;;  %v239_v13 = vld [vmem:[%s1220_s8 + $0x50] sm:$0xff]  ;;  %v240_v14 = vld [vmem:[%s1220_s8 + $0x58] sm:$0xff]  ;;  %v256_v25 = vmax.f32 %v231_v9, %v232_v10  ;;  %p203_p7 = scmp.lt.s32.totalorder %s1084_s15, 1 }
  0x38   : > { %v237_v15 = vld [vmem:[%s1220_s8 + $0x40] sm:$0xff]  ;;  %v238_v16 = vld [vmem:[%s1220_s8 + $0x48] sm:$0xff]  ;;  %v317_v17 = vadd.f32 %v240_v14, %v239_v13  ;;  %v243_v19 = vld [vmem:[%s1220_s8 + $0x70] sm:$0xff]  ;;  %v268_v29 = vmax.f32 %v239_v13, %v240_v14  ;;  %214 = vst.msk [vmem:[#allocation2 + $0x8] sm:$0xff] %vm212_vm0, %v1098_v33 }
  0x39   : > { %v314_v18 = vadd.f32 %v238_v16, %v237_v15  ;;  %v244_v20 = vld [vmem:[%s1220_s8 + $0x78] sm:$0xff]  ;;  %v241_v21 = vld [vmem:[%s1220_s8 + $0x60] sm:$0xff]  ;;  %v242_v22 = vld [vmem:[%s1220_s8 + $0x68] sm:$0xff]  ;;  %v265_v30 = vmax.f32 %v237_v15, %v238_v16  ;;  %213 = vst.msk [vmem:[#allocation2] sm:$0xff] %vm212_vm0, %v1098_v33  ;;  %s1102_s8 = smov 127   ;;  %s1380_s15 = smov (!%p203_p7, %s1084_s15), 1 }
  0x3a   : > { %312 = vadd.xlane.f32.xlu1 %v311_v11  ;;  %v323_v23 = vadd.f32 %v244_v20, %v243_v19  ;;  %v320_v24 = vadd.f32 %v242_v22, %v241_v21  ;;  %v274_v31 = vmax.f32 %v243_v19, %v244_v20  ;;  %v271_v32 = vmax.f32 %v241_v21, %v242_v22 }
  0x3b   : > { %306 = vadd.xlane.f32.xlu0 %v305_v12  ;;  %215 = vst.msk [vmem:[#allocation2 + $0x10] sm:$0xff] %vm212_vm0, %v1098_v33  ;;  %216 = vst.msk [vmem:[#allocation2 + $0x18] sm:$0xff] %vm212_vm0, %v1098_v33  ;;  %v296_v34 = vld [vmem:[#allocation3 + $0x10] sm:$0xff]  ;;  %v294_v35 = vld [vmem:[#allocation3] sm:$0xff] }
  0x3c   : > { %217 = vst.msk [vmem:[#allocation2 + $0x20] sm:$0xff] %vm212_vm0, %v1098_v33  ;;  %218 = vst.msk [vmem:[#allocation2 + $0x28] sm:$0xff] %vm212_vm0, %v1098_v33  ;;  %v297_v40 = vld [vmem:[#allocation3 + $0x18] sm:$0xff]  ;;  %v295_v41 = vld [vmem:[#allocation3 + $0x8] sm:$0xff] }
  0x3d   : > { %219 = vst.msk [vmem:[#allocation2 + $0x30] sm:$0xff] %vm212_vm0, %v1098_v33  ;;  %220 = vst.msk [vmem:[#allocation2 + $0x38] sm:$0xff] %vm212_vm0, %v1098_v33  ;;  %v299_v46 = vld [vmem:[#allocation3 + $0x28] sm:$0xff]  ;;  %v298_v47 = vld [vmem:[#allocation3 + $0x20] sm:$0xff] }
  0x3e   : > { %318 = vadd.xlane.f32.xlu1 %v317_v17  ;;  %v301_v52 = vld [vmem:[#allocation3 + $0x38] sm:$0xff]  ;;  %v300_v54 = vld [vmem:[#allocation3 + $0x30] sm:$0xff] }
  0x3f   : > { %315 = vadd.xlane.f32.xlu0 %v314_v18  ;;  %v246_v63 = vld [vmem:[#allocation2 + $0x8] sm:$0xff] }
  0x40   : > { %v245_v3 = vld [vmem:[#allocation2] sm:$0xff] }
  0x42   : > { %324 = vadd.xlane.f32.xlu1 %v323_v23  ;;  %v248_v13 = vld [vmem:[#allocation2 + $0x18] sm:$0xff]  ;;  %v247_v16 = vld [vmem:[#allocation2 + $0x10] sm:$0xff] }
  0x43   : > { %321 = vadd.xlane.f32.xlu0 %v320_v24  ;;  %v250_v24 = vld [vmem:[#allocation2 + $0x28] sm:$0xff] }
  0x46   : > { %257 = vmax.xlane.f32.xlu1 %v256_v25 }
  0x47   : > { %254 = vmax.xlane.f32.xlu0 %v253_v26 }
  0x4a   : > { %263 = vmax.xlane.f32.xlu1 %v262_v27  ;;  %v249_v27 = vld [vmem:[#allocation2 + $0x20] sm:$0xff] }
  0x4b   : > { %260 = vmax.xlane.f32.xlu0 %v259_v28 }
  0x4e   : > { %269 = vmax.xlane.f32.xlu1 %v268_v29 }
  0x4f   : > { %266 = vmax.xlane.f32.xlu0 %v265_v30 }
  0x52   : > { %275 = vmax.xlane.f32.xlu1 %v274_v31 }
  0x53   : > { %272 = vmax.xlane.f32.xlu0 %v271_v32 }
  0xc3   : > { %v310_v36 = vpop.xlane.xlu1 %309 }
  0xc4   : > { %v328_v37 = vadd.f32 %v310_v36, %v296_v34  ;;  %v304_v38 = vpop.xlane.xlu0 %303  ;;  %v252_v34 = vld [vmem:[#allocation2 + $0x38] sm:$0xff] }
  0xc5   : > { %v326_v39 = vadd.f32 %v304_v38, %v294_v35  ;;  %v251_v35 = vld [vmem:[#allocation2 + $0x30] sm:$0xff] }
  0xc6   : > { %336 = vst.msk [vmem:[#allocation3 + $0x10] sm:$0xff] %vm212_vm0, %v328_v37 }
  0xc7   : > { %334 = vst.msk [vmem:[#allocation3] sm:$0xff] %vm212_vm0, %v326_v39  ;;  %v313_v42 = vpop.xlane.xlu1 %312 }
  0xc8   : > { %v329_v43 = vadd.f32 %v313_v42, %v297_v40  ;;  %v307_v44 = vpop.xlane.xlu0 %306 }
  0xc9   : > { %v327_v45 = vadd.f32 %v307_v44, %v295_v41 }
  0xca   : > { %337 = vst.msk [vmem:[#allocation3 + $0x18] sm:$0xff] %vm212_vm0, %v329_v43 }
  0xcb   : > { %335 = vst.msk [vmem:[#allocation3 + $0x8] sm:$0xff] %vm212_vm0, %v327_v45  ;;  %v319_v48 = vpop.xlane.xlu1 %318 }
  0xcc   : > { %v331_v49 = vadd.f32 %v319_v48, %v299_v46  ;;  %v316_v50 = vpop.xlane.xlu0 %315 }
  0xcd   : > { %v330_v51 = vadd.f32 %v316_v50, %v298_v47  ;;  %v347_v53 = vld [vmem:[#allocation3 + $0x10] sm:$0xff] }
  0xce   : > { %339 = vst.msk [vmem:[#allocation3 + $0x28] sm:$0xff] %vm212_vm0, %v331_v49  ;;  %v355_v59 = vmul.f32 0.00390625, %v347_v53  ;;  %v345_v60 = vld [vmem:[#allocation3] sm:$0xff] }
  0xcf   : > { %338 = vst.msk [vmem:[#allocation3 + $0x20] sm:$0xff] %vm212_vm0, %v330_v51  ;;  %v325_v56 = vpop.xlane.xlu1 %324  ;;  %v353_v4 = vmul.f32 0.00390625, %v345_v60 }
  0xd0   : > { %v333_v57 = vadd.f32 %v325_v56, %v301_v52  ;;  %v322_v58 = vpop.xlane.xlu0 %321 }
  0xd1   : > { %v332_v61 = vadd.f32 %v322_v58, %v300_v54  ;;  %v348_v62 = vld [vmem:[#allocation3 + $0x18] sm:$0xff] }
  0xd2   : > { %341 = vst.msk [vmem:[#allocation3 + $0x38] sm:$0xff] %vm212_vm0, %v333_v57  ;;  %v356_v1 = vmul.f32 0.00390625, %v348_v62  ;;  %v346_v2 = vld [vmem:[#allocation3 + $0x8] sm:$0xff] }
  0xd3   : > { %340 = vst.msk [vmem:[#allocation3 + $0x30] sm:$0xff] %vm212_vm0, %v332_v61  ;;  %v354_v5 = vmul.f32 0.00390625, %v346_v2  ;;  %v258_v6 = vpop.xlane.xlu1 %257 }
  0xd4   : > { %v965_v7 = vpack.i.bf16 %v356_v1, %v355_v59  ;;  %v278_v8 = vmax.f32 %v246_v63, %v258_v6  ;;  %v255_v9 = vpop.xlane.xlu0 %254 }
  0xd5   : > { %v960_v10 = vpack.i.bf16 %v354_v5, %v353_v4  ;;  %v350_v11 = vld [vmem:[#allocation3 + $0x28] sm:$0xff]  ;;  %v277_v12 = vmax.f32 %v245_v3, %v255_v9  ;;  %v409_v9 = vld [vmem:[%s1366_s1] sm:$0xf] }
  0xd6   : > { %966 = vrot.lane.b32.xlu1 %v965_v7, %s1100_s23  ;;  %v349_v14 = vld [vmem:[#allocation3 + $0x20] sm:$0xff]  ;;  %v358_v15 = vmul.f32 0.00390625, %v350_v11  ;;  %287 = vst.msk [vmem:[#allocation2 + $0x8] sm:$0xff] %vm212_vm0, %v278_v8 }
  0xd7   : > { %961 = vrot.lane.b32.xlu0 %v960_v10, %s1100_s23  ;;  %v357_v17 = vmul.f32 0.00390625, %v349_v14  ;;  %286 = vst.msk [vmem:[#allocation2] sm:$0xff] %vm212_vm0, %v277_v12  ;;  %v264_v18 = vpop.xlane.xlu1 %263  ;;  %v485_v10 = vld [vmem:[%s1367_s2] sm:$0xff]  ;;  %v487_v14 = vld [vmem:[%s1367_s2 + $0x10] sm:$0xff] }
  0xd8   : > { %v280_v19 = vmax.f32 %v248_v13, %v264_v18  ;;  %v261_v20 = vpop.xlane.xlu0 %260  ;;  %873 = vmatprep.mubr.msk.f32.mxu1 %vm493_vm3, %v485_v10  ;;  %v491_v18 = vld [vmem:[%s1367_s2 + $0x30] sm:$0xff] }
  0xd9   : > { %v970_v21 = vpack.i.bf16 %v358_v15, %v357_v17  ;;  %v352_v22 = vld [vmem:[#allocation3 + $0x38] sm:$0xff]  ;;  %v279_v23 = vmax.f32 %v247_v16, %v261_v20  ;;  %v489_v16 = vld [vmem:[%s1367_s2 + $0x20] sm:$0xff]  ;;  %v490_v17 = vld [vmem:[%s1367_s2 + $0x28] sm:$0xff] }
  0xda   : > { %v351_v25 = vld [vmem:[#allocation3 + $0x30] sm:$0xff]  ;;  %v360_v26 = vmul.f32 0.00390625, %v352_v22  ;;  %289 = vst.msk [vmem:[#allocation2 + $0x18] sm:$0xff] %vm212_vm0, %v280_v19  ;;  %v488_v15 = vld [vmem:[%s1367_s2 + $0x18] sm:$0xff] }
  0xdb   : > { %971 = vrot.lane.b32.xlu1 %v970_v21, %s1100_s23  ;;  %v359_v28 = vmul.f32 0.00390625, %v351_v25  ;;  %288 = vst.msk [vmem:[#allocation2 + $0x10] sm:$0xff] %vm212_vm0, %v279_v23  ;;  %v270_v29 = vpop.xlane.xlu1 %269  ;;  %v492_v19 = vld [vmem:[%s1367_s2 + $0x38] sm:$0xff] }
  0xdc   : > { %v282_v30 = vmax.f32 %v250_v24, %v270_v29  ;;  %v267_v31 = vpop.xlane.xlu0 %266 }
  0xdd   : > { %v975_v32 = vpack.i.bf16 %v360_v26, %v359_v28  ;;  %v281_v33 = vmax.f32 %v249_v27, %v267_v31  ;;  %v362_v46 = vld [vmem:[#allocation2 + $0x8] sm:$0xff] }
  0xde   : > { %291 = vst.msk [vmem:[#allocation2 + $0x28] sm:$0xff] %vm212_vm0, %v282_v30  ;;  %v361_v45 = vld [vmem:[#allocation2] sm:$0xff] }
  0xdf   : > { %976 = vrot.lane.b32.xlu1 %v975_v32, %s1100_s23  ;;  %290 = vst.msk [vmem:[#allocation2 + $0x20] sm:$0xff] %vm212_vm0, %v281_v33  ;;  %v276_v36 = vpop.xlane.xlu1 %275  ;;  %s833_s23 = sshll.u32 %s1380_s15, 6 }
  0xe0   : > { %v284_v37 = vmax.f32 %v252_v34, %v276_v36  ;;  %v273_v38 = vpop.xlane.xlu0 %272  ;;  %s207_s6 = scalar_lea.vmem %s1368_s3, %s833_s23 }
  0xe1   : > { %v283_v39 = vmax.f32 %v251_v35, %v273_v38  ;;  %v364_v47 = vld [vmem:[#allocation2 + $0x18] sm:$0xff] }
  0xe2   : > { %293 = vst.msk [vmem:[#allocation2 + $0x38] sm:$0xff] %vm212_vm0, %v284_v37  ;;  %v363_v52 = vld [vmem:[#allocation2 + $0x10] sm:$0xff] }
  0xe3   : > { %292 = vst.msk [vmem:[#allocation2 + $0x30] sm:$0xff] %vm212_vm0, %v283_v39 }
  0xe5   : > { %v366_v58 = vld [vmem:[#allocation2 + $0x28] sm:$0xff] }
  0xe6   : > { %v365_v61 = vld [vmem:[#allocation2 + $0x20] sm:$0xff] }
  0xe9   : > { %v368_v3 = vld [vmem:[#allocation2 + $0x38] sm:$0xff] }
  0xea   : > { %v367_v5 = vld [vmem:[#allocation2 + $0x30] sm:$0xff] }
 0x148   : > { %v967_v40 = vpop.permute.xlu1 %966 }
 0x149   : > { %v962_v0 = vpop.permute.xlu0 %961  ;;  %v969_v41 = vunpack.i.h.bf16 %v967_v40  ;;  %v968_v42 = vunpack.i.l.bf16 %v967_v40 }
 0x14a   : > { %v964_v43 = vunpack.i.h.bf16 %v962_v0  ;;  %v963_v44 = vunpack.i.l.bf16 %v962_v0 }
 0x14b   : > { %v403_v56 = vsel %vm212_vm0, %v363_v52, %v968_v42  ;;  %v404_v57 = vsel %vm212_vm0, %v364_v47, %v969_v41 }
 0x14c   : > { %v401_v48 = vsel %vm212_vm0, %v361_v45, %v963_v44  ;;  %v402_v49 = vsel %vm212_vm0, %v362_v46, %v964_v43  ;;  %v889_v60 = vpack.c.bf16 %v404_v57, %v403_v56 }
 0x14d   : > { %v972_v50 = vpop.permute.xlu1 %971  ;;  %v886_v51 = vpack.c.bf16 %v402_v49, %v401_v48 }
 0x14e   : > { %v974_v53 = vunpack.i.h.bf16 %v972_v50  ;;  %v973_v54 = vunpack.i.l.bf16 %v972_v50 }
 0x14f   : > { %887 = vmatpush3.bf16.msra.mxu0 %v886_v51 }
 0x150   : > { %888 = vmatprep.subr.bf16.mxu0 %v1099_v55  ;;  %v405_v1 = vsel %vm212_vm0, %v365_v61, %v973_v54  ;;  %v406_v2 = vsel %vm212_vm0, %v366_v58, %v974_v53 }
 0x151   : > { %v977_v59 = vpop.permute.xlu1 %976  ;;  %v892_v4 = vpack.c.bf16 %v406_v2, %v405_v1 }
 0x152   : > { %v979_v62 = vunpack.i.h.bf16 %v977_v59  ;;  %v978_v63 = vunpack.i.l.bf16 %v977_v59 }
 0x153   : > { %890 = vmatpush3.bf16.msra.mxu0 %v889_v60 }
 0x154   : > { %891 = vmatprep.subr.bf16.mxu0 %v1099_v55  ;;  %v407_v6 = vsel %vm212_vm0, %v367_v5, %v978_v63  ;;  %v408_v7 = vsel %vm212_vm0, %v368_v3, %v979_v62 }
 0x155   : > { %v895_v8 = vpack.c.bf16 %v408_v7, %v407_v6 }
 0x157   : > { %893 = vmatpush3.bf16.msra.mxu0 %v892_v4 }
 0x158   : > { %894 = vmatprep.subr.bf16.mxu0 %v1099_v55  ;;  %v486_v55 = vld [vmem:[%s1367_s2 + $0x8] sm:$0xff] }
 0x15b   : > { %896 = vmatpush3.bf16.msra.mxu0 %v895_v8 }
 0x15e   : > { %869 = vmatmul.mubr.msk.f32.vlgmr.msra.gmra.mrb[0].mxu0 %vm410_vm2, %v409_v9 }
 0x231   : > { %v480_v11 = vpop.f32.mrb[0].mxu0 }
 0x232   : > { %v484_v12 = vmax.f32 %v480_v11, 0.0  ;;  %v870_v13 = vpop.f32.mrb[1].mxu0 }
 0x234   : > { %871 = vmatprep.subr.msk.mxu1 %vm518_vm4, %v484_v12 }
 0x235   : > { %872 = vmatpush3.msk.msra.mxu1 %vm518_vm4, %v484_v12 }
 0x236   : > { %874 = vmatmul.mubr.msk.f32.vlgmr.msra.gmra.mrb[0].mxu1 %vm493_vm3, %v486_v55 }
 0x237   : > { %876 = vmatprep.mubr.msk.f32.mxu1 %vm493_vm3, %v487_v14 }
 0x23a   : > { %877 = vmatmul.mubr.msk.f32.gmra.mrb[2].mxu1 %vm493_vm3, %v488_v15 }
 0x23b   : > { %879 = vmatprep.mubr.msk.f32.mxu1 %vm493_vm3, %v489_v16 }
 0x23e   : > { %880 = vmatmul.mubr.msk.f32.gmra.mrb[4].mxu1 %vm493_vm3, %v490_v17 }
 0x23f   : > { %882 = vmatprep.mubr.msk.f32.mxu1 %vm493_vm3, %v491_v18 }
 0x242   : > { %883 = vmatmul.mubr.msk.f32.gmra.mrb[6].mxu1 %vm493_vm3, %v492_v19 }
 0x309   : > { %v875_v20 = vpop.f32.mrb[0].mxu1 }
 0x30a   : > { %637 = vrot.lane.b32.xlu1 %v875_v20, %s1102_s8  ;;  %v588_v21 = vpop.f32.mrb[1].mxu1 }
 0x30b   : > { %635 = vrot.lane.b32.xlu0 %v588_v21, %s1102_s8 }
 0x30d   : > { %v878_v22 = vpop.f32.mrb[2].mxu1 }
 0x30e   : > { %641 = vrot.lane.b32.xlu1 %v878_v22, %s1102_s8  ;;  %v598_v23 = vpop.f32.mrb[3].mxu1 }
 0x30f   : > { %639 = vrot.lane.b32.xlu0 %v598_v23, %s1102_s8 }
 0x311   : > { %v881_v24 = vpop.f32.mrb[4].mxu1 }
 0x312   : > { %645 = vrot.lane.b32.xlu1 %v881_v24, %s1102_s8  ;;  %v608_v25 = vpop.f32.mrb[5].mxu1 }
 0x313   : > { %643 = vrot.lane.b32.xlu0 %v608_v25, %s1102_s8 }
 0x315   : > { %v884_v26 = vpop.f32.mrb[6].mxu1 }
 0x316   : > { %649 = vrot.lane.b32.xlu1 %v884_v26, %s1102_s8  ;;  %v618_v27 = vpop.f32.mrb[7].mxu1 }
 0x317   : > { %647 = vrot.lane.b32.xlu0 %v618_v27, %s1102_s8 }
 0x37c   : > { %v638_v28 = vpop.permute.xlu1 %637 }
 0x37d   : > { %v660_v29 = vadd.f32 %v875_v20, %v638_v28  ;;  %v636_v30 = vpop.permute.xlu0 %635 }
 0x37e   : > { %v659_v31 = vadd.f32 %v636_v30, %v588_v21 }
 0x37f   : > { %v823_v32 = vmul.f32 -1.442695, %v660_v29 }
 0x380   : > { %v822_v33 = vmul.f32 -1.442695, %v659_v31  ;;  %v642_v34 = vpop.permute.xlu1 %641 }
 0x381   : > { %980 = vpow2.f32 %v823_v32  ;;  %v662_v35 = vadd.f32 %v878_v22, %v642_v34  ;;  %v640_v36 = vpop.permute.xlu0 %639 }
 0x382   : > { %982 = vpow2.f32 %v822_v33  ;;  %v661_v37 = vadd.f32 %v640_v36, %v598_v23 }
 0x383   : > { %v825_v38 = vmul.f32 -1.442695, %v662_v35 }
 0x384   : > { %v824_v39 = vmul.f32 -1.442695, %v661_v37  ;;  %v646_v40 = vpop.permute.xlu1 %645 }
 0x385   : > { %984 = vpow2.f32 %v825_v38  ;;  %v664_v0 = vadd.f32 %v881_v24, %v646_v40  ;;  %v644_v41 = vpop.permute.xlu0 %643 }
 0x386   : > { %986 = vpow2.f32 %v824_v39  ;;  %v663_v42 = vadd.f32 %v644_v41, %v608_v25 }
 0x387   : > { %v827_v43 = vmul.f32 -1.442695, %v664_v0 }
 0x388   : > { %v826_v44 = vmul.f32 -1.442695, %v663_v42  ;;  %v650_v45 = vpop.permute.xlu1 %649 }
 0x389   : > { %988 = vpow2.f32 %v827_v43  ;;  %v666_v46 = vadd.f32 %v884_v26, %v650_v45  ;;  %v648_v47 = vpop.permute.xlu0 %647 }
 0x38a   : > { %990 = vpow2.f32 %v826_v44  ;;  %v665_v48 = vadd.f32 %v648_v47, %v618_v27 }
 0x38b   : > { %v981_v49 = vpop.eup %980  ;;  %v829_v50 = vmul.f32 -1.442695, %v666_v46 }
 0x38c   : > { %v983_v51 = vpop.eup %982  ;;  %v692_v52 = vadd.f32 1.0, %v981_v49  ;;  %v828_v53 = vmul.f32 -1.442695, %v665_v48 }
 0x38d   : > { %v691_v54 = vadd.f32 1.0, %v983_v51  ;;  %992 = vpow2.f32 %v829_v50 }
 0x38e   : > { %994 = vrcp.f32 %v692_v52 }
 0x38f   : > { %v985_v56 = vpop.eup %984  ;;  %996 = vrcp.f32 %v691_v54 }
 0x390   : > { %v987_v57 = vpop.eup %986  ;;  %v694_v58 = vadd.f32 1.0, %v985_v56  ;;  %998 = vpow2.f32 %v828_v53 }
 0x391   : > { %v693_v59 = vadd.f32 1.0, %v987_v57 }
 0x392   : > { %1000 = vrcp.f32 %v694_v58 }
 0x393   : > { %v989_v60 = vpop.eup %988  ;;  %1002 = vrcp.f32 %v693_v59 }
 0x394   : > { %v991_v61 = vpop.eup %990  ;;  %v696_v62 = vadd.f32 1.0, %v989_v60 }
 0x395   : > { %v695_v63 = vadd.f32 1.0, %v991_v61 }
 0x396   : > { %1004 = vrcp.f32 %v696_v62 }
 0x397   : > { %v993_v1 = vpop.eup %992  ;;  %1006 = vrcp.f32 %v695_v63 }
 0x398   : > { %v995_v2 = vpop.eup %994  ;;  %v698_v3 = vadd.f32 1.0, %v993_v1 }
 0x399   : > { %v997_v4 = vpop.eup %996  ;;  %716 = vst.msk [vmem:[%s207_s6 + $0x8] sm:$0xff] %vm212_vm0, %v995_v2 }
 0x39a   : > { %v999_v5 = vpop.eup %998  ;;  %715 = vst.msk [vmem:[%s207_s6] sm:$0xff] %vm212_vm0, %v997_v4  ;;  %1008 = vrcp.f32 %v698_v3 }
 0x39b   : > { %v697_v6 = vadd.f32 1.0, %v999_v5 }
 0x39c   : > { %v1001_v7 = vpop.eup %1000 }
 0x39d   : > { %v1003_v8 = vpop.eup %1002  ;;  %718 = vst.msk [vmem:[%s207_s6 + $0x18] sm:$0xff] %vm212_vm0, %v1001_v7  ;;  %1010 = vrcp.f32 %v697_v6 }
 0x39e   : > { %717 = vst.msk [vmem:[%s207_s6 + $0x10] sm:$0xff] %vm212_vm0, %v1003_v8 }
 0x3a0   : > { %v1005_v9 = vpop.eup %1004 }
 0x3a1   : > { %v1007_v10 = vpop.eup %1006  ;;  %720 = vst.msk [vmem:[%s207_s6 + $0x28] sm:$0xff] %vm212_vm0, %v1005_v9 }
 0x3a2   : > { %719 = vst.msk [vmem:[%s207_s6 + $0x20] sm:$0xff] %vm212_vm0, %v1007_v10 }
 0x3a4   : > { %v1009_v11 = vpop.eup %1008 }
 0x3a5   : > { %722 = vst.msk [vmem:[%s207_s6 + $0x38] sm:$0xff] %vm212_vm0, %v1009_v11 }
 0x3a7   : > { %v1011_v12 = vpop.eup %1010 }
 0x3a8   : > { %721 = vst.msk [vmem:[%s207_s6 + $0x30] sm:$0xff] %vm212_vm0, %v1011_v12 }
 0x3a9 PF: > { %s16_s17 = sadd.s32 1, %s1092_s17   ;;  %s1372_s12 = smov %s1076_s13 }
 0x3aa   : > { %p13_p9 = scmp.ge.s32.totalorder %s16_s17, 4   ;;  %s1373_s13 = smov %s1080_s14 }
 0x3ab   : > { %s1374_s14 = smov %s1172_s24  ;;  %s1375_s15 = smov %s1088_s16 }
 0x3ac   : > { %s1376_s16 = smov %s1378_s19  ;;  %15 = sbr.rel (!%p13_p9) target bundleno = 4 (0x4), region = 80 }
 0x3b3   :  { %744 = vsyncpa [#allocation5], 1 }
 0x3b4   :  { %746 = vsyncpa [#allocation5 + $0x1], 1 }

</bundles_post_ra>
